<compile_context>
chip_gen: v5e
topology: v5e:2x2
jax: 0.10.0
libtpu: 0.0.40
codegen_flags: <defaults>
</compile_context>

<pallas_src>
import functools

import jax
import jax.numpy as jnp
import numpy as np
from jax.experimental import pallas as pl
from jax.experimental.pallas import tpu as pltpu

CHANNEL_CNN = 128
CHANNEL_FC = 128
CONV_K = 4
SEQ = 8                       # conv output length == 5 matches torch incoming_size
CONV_OUT = SEQ - CONV_K + 1   # 5
IN_CHANNELS = 8               # forward indexes channels 2, 6, 7
CONV_FLAT = CONV_OUT * CHANNEL_CNN  # 640

TB_CAP = 1024                 # max rows per grid step (VMEM-safe on v5e/v6e/v7x)
SPLIT_MIN = 256               # below this: single grid step; above: >=2 even steps


def place_critic_kernel(thr_ref, s67_ref, wt_ref, cb_ref, w1_ref, wh_ref,
                        consts_ref, out_ref):
    bf16 = jnp.bfloat16

    # Conv1d(1,128,4) as a single block-Toeplitz matmul: (TB,8)bf16 @ (8,640)bf16 -> f32.
    conv = jnp.dot(thr_ref[...].astype(bf16), wt_ref[...],
                   preferred_element_type=jnp.float32)
    x1f = jnp.maximum(conv + cb_ref[...], 0.0)                        # (TB, 640) f32

    # Consolidated (8, AP) constants: rows = [w3, b3, w4, b4, b1, bh_pad, 0, 0].
    w3 = consts_ref[0:1, 0:CHANNEL_FC]
    b3 = consts_ref[1:2, 0:CHANNEL_FC]
    w4 = consts_ref[2:3, 0:CHANNEL_FC]
    b4 = consts_ref[3:4, 0:CHANNEL_FC]
    b1 = consts_ref[4:5, 0:CHANNEL_FC]
    bh = consts_ref[5:6, :]                                           # (1, AP)

    # Linear(1,128) heads: K=1 contraction -> VPU broadcast multiply, no MXU round-trip.
    s6 = s67_ref[:, 0:1]
    s7 = s67_ref[:, 1:2]
    x5 = jnp.maximum(s6 * w3 + b3, 0.0)                               # (TB, 128) f32
    x6 = jnp.maximum(s7 * w4 + b4, 0.0)                               # (TB, 128) f32

    # fc1 as three accumulating bf16 matmuls on tile-aligned views of w1 (no concat copy).
    h = (jnp.dot(x1f.astype(bf16), w1_ref[0:CONV_FLAT, :],
                 preferred_element_type=jnp.float32)
         + jnp.dot(x5.astype(bf16), w1_ref[CONV_FLAT:CONV_FLAT + CHANNEL_FC, :],
                   preferred_element_type=jnp.float32)
         + jnp.dot(x6.astype(bf16),
                   w1_ref[CONV_FLAT + CHANNEL_FC:CONV_FLAT + 2 * CHANNEL_FC, :],
                   preferred_element_type=jnp.float32)
         + b1)
    h = jnp.maximum(h, 0.0)                                           # (TB, 128) f32

    # Action head + softmax. Padded action columns have bias -1e30 -> exp() == 0.
    logits = jnp.dot(h.astype(bf16), wh_ref[...],
                     preferred_element_type=jnp.float32) + bh
    m = jnp.max(logits, axis=1, keepdims=True)
    e = jnp.exp(logits - m)
    denom = jnp.sum(e, axis=1, keepdims=True)
    out_ref[...] = e / denom                                          # exact normalization


def pack_params(params, action_space):
    """One-time weight packing (Toeplitz conv, fc1 reorder, head padding, bf16 casts)."""
    f32, bf16 = jnp.float32, jnp.bfloat16

    # Block-Toeplitz conv weight: conv_flat = thr @ w_toep, columns (t, c)-major.
    cw = params["conv_w"].reshape(CHANNEL_CNN, CONV_K)                # (128, 4)
    s_idx = jnp.arange(SEQ)[:, None]                                  # (8, 1)
    t_idx = jnp.arange(CONV_OUT)[None, :]                             # (1, 5)
    k = s_idx - t_idx                                                 # (8, 5)
    valid = (k >= 0) & (k < CONV_K)
    toep = jnp.where(valid[..., None], cw.T[jnp.clip(k, 0, CONV_K - 1)], 0.0)  # (8,5,128)
    w_toep = toep.reshape(SEQ, CONV_FLAT).astype(bf16)                # (8, 640) bf16
    cb = jnp.tile(params["conv_b"], CONV_OUT).reshape(1, CONV_FLAT).astype(f32)

    # fc1 weight (128, 896); torch conv flatten is channel-major (col = c*5 + t), the
    # kernel's x1f is (t, c)-major (col = t*128 + c) -> reorder first 640 columns.
    fc1_w = params["fc1_w"]
    w1a = jnp.transpose(
        fc1_w[:, :CONV_FLAT].reshape(CHANNEL_FC, CHANNEL_CNN, CONV_OUT),
        (2, 1, 0)).reshape(CONV_FLAT, CHANNEL_FC)                     # (640, 128)
    w1b = fc1_w[:, CONV_FLAT:CONV_FLAT + CHANNEL_FC].T                # (128, 128)
    w1c = fc1_w[:, CONV_FLAT + CHANNEL_FC:CONV_FLAT + 2 * CHANNEL_FC].T
    w1 = jnp.concatenate([w1a, w1b, w1c], axis=0).astype(bf16)        # (896, 128) bf16

    # Lane-dense action head: pad columns up to a multiple of 128.
    AP = max(128, ((action_space + 127) // 128) * 128)
    wh = jnp.zeros((CHANNEL_FC, AP), bf16).at[:, :action_space].set(
        params["head_w"].T.astype(bf16))

    # Stack the six (1,128)-wide constants into one (8, AP) array (rows 6,7 unused).
    consts = jnp.zeros((8, AP), f32)
    consts = consts.at[0, :CHANNEL_FC].set(params["fc3_w"].reshape(CHANNEL_FC))
    consts = consts.at[1, :CHANNEL_FC].set(params["fc3_b"])
    consts = consts.at[2, :CHANNEL_FC].set(params["fc4_w"].reshape(CHANNEL_FC))
    consts = consts.at[3, :CHANNEL_FC].set(params["fc4_b"])
    consts = consts.at[4, :CHANNEL_FC].set(params["fc1_b"])
    consts = consts.at[5, :].set(-1e30)                               # pad bias -> exp()==0
    consts = consts.at[5, :action_space].set(params["head_b"])

    return {"w_toep": w_toep, "cb": cb, "w1": w1, "wh": wh, "consts": consts}


def _round_up(a, m):
    return ((a + m - 1) // m) * m


def _batch_tiling(B):
    """Return (Bp, TB, nb): padded batch, tile rows (mult. of 8), grid steps (even if >1)."""
    Bp = _round_up(max(B, 8), 8)
    if Bp <= SPLIT_MIN:
        return Bp, Bp, 1
    nb = max(2, -(-Bp // TB_CAP))
    if nb % 2:
        nb += 1                                   # even step count for v7x dual-TC balance
    TB = _round_up(-(-Bp // nb), 8)
    return nb * TB, TB, nb


@functools.partial(jax.jit, static_argnames=("action_space",))
def place_critic_forward(x, packed, *, action_space):
    B = x.shape[0]
    f32 = jnp.float32
    AP = packed["wh"].shape[1]

    # Channel extraction in the wrapper (free XLA slices, lane-clean kernel inputs).
    thr = x[:, 2, :].astype(f32)            # (B, SEQ)
    s67 = x[:, 6:8, -1].astype(f32)         # (B, 2)  [channel 6, channel 7]

    Bp, TB, nb = _batch_tiling(B)
    if Bp != B:
        pad = Bp - B
        thr = jnp.pad(thr, ((0, pad), (0, 0)))
        s67 = jnp.pad(s67, ((0, pad), (0, 0)))

    def batch_spec(cols):
        return pl.BlockSpec((TB, cols), lambda i: (i, 0))

    def const_spec(arr):
        return pl.BlockSpec(arr.shape, lambda i: (0, 0))

    out = pl.pallas_call(
        place_critic_kernel,
        out_shape=jax.ShapeDtypeStruct((Bp, AP), f32),
        grid=(nb,),
        in_specs=[
            batch_spec(SEQ), batch_spec(2),
            const_spec(packed["w_toep"]), const_spec(packed["cb"]),
            const_spec(packed["w1"]), const_spec(packed["wh"]),
            const_spec(packed["consts"]),
        ],
        out_specs=pl.BlockSpec((TB, AP), lambda i: (i, 0)),
        compiler_params=pltpu.CompilerParams(
            dimension_semantics=("parallel",),
            vmem_limit_bytes=32 * 1024 * 1024),
    )(thr, s67, packed["w_toep"], packed["cb"], packed["w1"], packed["wh"],
      packed["consts"])

    return out[:B, :action_space]


def reference_forward(x, params):
    """Pure-JAX mirror of the PyTorch forward (torch weight conventions)."""
    B = x.shape[0]
    thr = x[:, 2:3, :]                                    # (B, 1, S)
    cw = params["conv_w"]                                 # (128, 1, 4)
    cols = [jnp.einsum("bis,ois->bo", thr[:, :, t:t + CONV_K], cw)
            for t in range(CONV_OUT)]
    conv = jnp.stack(cols, axis=-1) + params["conv_b"][None, :, None]   # (B, 128, 5)
    x1 = jax.nn.relu(conv).reshape(B, -1)                 # (B, 640) channel-major
    s6 = x[:, 6:7, -1]
    s7 = x[:, 7:8, -1]
    x5 = jax.nn.relu(s6 @ params["fc3_w"].T + params["fc3_b"])
    x6 = jax.nn.relu(s7 @ params["fc4_w"].T + params["fc4_b"])
    cat = jnp.concatenate([x1, x5, x6], axis=1)           # (B, 896)
    h = jax.nn.relu(cat @ params["fc1_w"].T + params["fc1_b"])
    logits = h @ params["head_w"].T + params["head_b"]
    return jax.nn.softmax(logits, axis=1)


def init_params(key, action_space):
    ks = jax.random.split(key, 10)
    incoming = CONV_FLAT + 2 * CHANNEL_FC  # 896
    s = 0.1
    return {
        "conv_w": s * jax.random.normal(ks[0], (CHANNEL_CNN, 1, CONV_K), jnp.float32),
        "conv_b": s * jax.random.normal(ks[1], (CHANNEL_CNN,), jnp.float32),
        "fc3_w": s * jax.random.normal(ks[2], (CHANNEL_FC, 1), jnp.float32),
        "fc3_b": s * jax.random.normal(ks[3], (CHANNEL_FC,), jnp.float32),
        "fc4_w": s * jax.random.normal(ks[4], (CHANNEL_FC, 1), jnp.float32),
        "fc4_b": s * jax.random.normal(ks[5], (CHANNEL_FC,), jnp.float32),
        "fc1_w": s * jax.random.normal(ks[6], (CHANNEL_FC, incoming), jnp.float32),
        "fc1_b": s * jax.random.normal(ks[7], (CHANNEL_FC,), jnp.float32),
        "head_w": s * jax.random.normal(ks[8], (action_space, CHANNEL_FC), jnp.float32),
        "head_b": s * jax.random.normal(ks[9], (action_space,), jnp.float32),
    }


if __name__ == "__main__":
    ACTION_SPACE = 6

    key = jax.random.PRNGKey(0)
    kp, kx = jax.random.split(key)
    params = init_params(kp, ACTION_SPACE)
    packed = pack_params(params, ACTION_SPACE)   # one-time weight packing (hoisted)

    # B=2: small-batch path.  B=300: pad + multi-step (2-core) grid path.
    for B in (2, 300):
        x = jax.random.normal(jax.random.fold_in(kx, B),
                              (B, IN_CHANNELS, SEQ), jnp.float32)
        out = jax.block_until_ready(
            place_critic_forward(x, packed, action_space=ACTION_SPACE))
        ref = jax.block_until_ready(reference_forward(x, params))
        assert out.shape == (B, ACTION_SPACE)
        np.testing.assert_allclose(np.asarray(out), np.asarray(ref),
                                   rtol=1e-2, atol=5e-3)
        np.testing.assert_allclose(np.asarray(out).sum(axis=1), np.ones(B),
                                   rtol=1e-5, atol=1e-5)

    print("KERNEL_OK")
</pallas_src>

<mosaic_0001>
module attributes {stable_mosaic.version = 11 : i64} {
  func.func @place_critic_kernel(%arg0: i32, %arg1: memref<8x8xf32, #tpu.memory_space<vmem>>, %arg2: memref<8x2xf32, #tpu.memory_space<vmem>>, %arg3: memref<8x640xbf16, #tpu.memory_space<vmem>>, %arg4: memref<1x640xf32, #tpu.memory_space<vmem>>, %arg5: memref<896x128xbf16, #tpu.memory_space<vmem>>, %arg6: memref<128x128xbf16, #tpu.memory_space<vmem>>, %arg7: memref<8x128xf32, #tpu.memory_space<vmem>>, %arg8: memref<8x128xf32, #tpu.memory_space<vmem>>) attributes {dimension_semantics = [#tpu.dimension_semantics<parallel>], iteration_bounds = array<i64: 1>, scalar_prefetch = 0 : i64, scratch_operands = 0 : i64, tpu.core_type = #tpu.core_type<tc>, window_params = [{transform_indices = @transform_0, window_bounds = array<i64: 8, 8>}, {transform_indices = @transform_1, window_bounds = array<i64: 8, 2>}, {pipeline_mode = #tpu.pipeline_mode<synchronous>, transform_indices = @transform_2, window_bounds = array<i64: 8, 640>}, {pipeline_mode = #tpu.pipeline_mode<synchronous>, transform_indices = @transform_3, window_bounds = array<i64: 1, 640>}, {pipeline_mode = #tpu.pipeline_mode<synchronous>, transform_indices = @transform_4, window_bounds = array<i64: 896, 128>}, {pipeline_mode = #tpu.pipeline_mode<synchronous>, transform_indices = @transform_5, window_bounds = array<i64: 128, 128>}, {pipeline_mode = #tpu.pipeline_mode<synchronous>, transform_indices = @transform_6, window_bounds = array<i64: 8, 128>}, {transform_indices = @transform_7, window_bounds = array<i64: 8, 128>}]} {
    %c0 = arith.constant 0 : index
    %c0_0 = arith.constant 0 : index
    %0 = vector.load %arg1[%c0, %c0_0] : memref<8x8xf32, #tpu.memory_space<vmem>>, vector<8x8xf32>
    %1 = arith.truncf %0 : vector<8x8xf32> to vector<8x8xbf16>
    %c0_1 = arith.constant 0 : index
    %c0_2 = arith.constant 0 : index
    %2 = vector.load %arg3[%c0_1, %c0_2] : memref<8x640xbf16, #tpu.memory_space<vmem>>, vector<8x640xbf16>
    %cst = arith.constant dense<0.000000e+00> : vector<8x640xf32>
    %3 = tpu.matmul %1, %2, %cst {dimension_numbers = #tpu.dot_dimension_numbers<[1], [0], [0], [1], [0, 0, 1, 1], [], []>} : vector<8x8xbf16>, vector<8x640xbf16>, vector<8x640xf32> -> vector<8x640xf32>
    %c0_3 = arith.constant 0 : index
    %c0_4 = arith.constant 0 : index
    %4 = vector.load %arg4[%c0_3, %c0_4] : memref<1x640xf32, #tpu.memory_space<vmem>>, vector<1x640xf32>
    %5 = vector.broadcast %4 : vector<1x640xf32> to vector<8x640xf32>
    %6 = arith.addf %3, %5 : vector<8x640xf32>
    %cst_5 = arith.constant 0.000000e+00 : f32
    %7 = vector.broadcast %cst_5 : f32 to vector<8x640xf32>
    %8 = arith.maximumf %6, %7 : vector<8x640xf32>
    %c0_6 = arith.constant 0 : index
    %c0_7 = arith.constant 0 : index
    %9 = vector.load %arg7[%c0_6, %c0_7] : memref<8x128xf32, #tpu.memory_space<vmem>>, vector<1x128xf32>
    %c1 = arith.constant 1 : index
    %c0_8 = arith.constant 0 : index
    %10 = vector.load %arg7[%c1, %c0_8] : memref<8x128xf32, #tpu.memory_space<vmem>>, vector<1x128xf32>
    %c2 = arith.constant 2 : index
    %c0_9 = arith.constant 0 : index
    %11 = vector.load %arg7[%c2, %c0_9] : memref<8x128xf32, #tpu.memory_space<vmem>>, vector<1x128xf32>
    %c3 = arith.constant 3 : index
    %c0_10 = arith.constant 0 : index
    %12 = vector.load %arg7[%c3, %c0_10] : memref<8x128xf32, #tpu.memory_space<vmem>>, vector<1x128xf32>
    %c4 = arith.constant 4 : index
    %c0_11 = arith.constant 0 : index
    %13 = vector.load %arg7[%c4, %c0_11] : memref<8x128xf32, #tpu.memory_space<vmem>>, vector<1x128xf32>
    %c5 = arith.constant 5 : index
    %c0_12 = arith.constant 0 : index
    %14 = vector.load %arg7[%c5, %c0_12] : memref<8x128xf32, #tpu.memory_space<vmem>>, vector<1x128xf32>
    %c0_13 = arith.constant 0 : index
    %c0_14 = arith.constant 0 : index
    %15 = vector.load %arg2[%c0_13, %c0_14] : memref<8x2xf32, #tpu.memory_space<vmem>>, vector<8x1xf32>
    %c0_15 = arith.constant 0 : index
    %c1_16 = arith.constant 1 : index
    %16 = vector.load %arg2[%c0_15, %c1_16] : memref<8x2xf32, #tpu.memory_space<vmem>>, vector<8x1xf32>
    %17 = vector.broadcast %15 : vector<8x1xf32> to vector<8x128xf32>
    %18 = vector.broadcast %9 : vector<1x128xf32> to vector<8x128xf32>
    %19 = arith.mulf %17, %18 : vector<8x128xf32>
    %20 = vector.broadcast %10 : vector<1x128xf32> to vector<8x128xf32>
    %21 = arith.addf %19, %20 : vector<8x128xf32>
    %cst_17 = arith.constant 0.000000e+00 : f32
    %22 = vector.broadcast %cst_17 : f32 to vector<8x128xf32>
    %23 = arith.maximumf %21, %22 : vector<8x128xf32>
    %24 = vector.broadcast %16 : vector<8x1xf32> to vector<8x128xf32>
    %25 = vector.broadcast %11 : vector<1x128xf32> to vector<8x128xf32>
    %26 = arith.mulf %24, %25 : vector<8x128xf32>
    %27 = vector.broadcast %12 : vector<1x128xf32> to vector<8x128xf32>
    %28 = arith.addf %26, %27 : vector<8x128xf32>
    %cst_18 = arith.constant 0.000000e+00 : f32
    %29 = vector.broadcast %cst_18 : f32 to vector<8x128xf32>
    %30 = arith.maximumf %28, %29 : vector<8x128xf32>
    %31 = arith.truncf %8 : vector<8x640xf32> to vector<8x640xbf16>
    %c0_19 = arith.constant 0 : index
    %c0_20 = arith.constant 0 : index
    %32 = vector.load %arg5[%c0_19, %c0_20] : memref<896x128xbf16, #tpu.memory_space<vmem>>, vector<640x128xbf16>
    %cst_21 = arith.constant dense<0.000000e+00> : vector<8x128xf32>
    %33 = tpu.matmul %31, %32, %cst_21 {dimension_numbers = #tpu.dot_dimension_numbers<[1], [0], [0], [1], [0, 0, 1, 1], [], []>} : vector<8x640xbf16>, vector<640x128xbf16>, vector<8x128xf32> -> vector<8x128xf32>
    %34 = arith.truncf %23 : vector<8x128xf32> to vector<8x128xbf16>
    %c640 = arith.constant 640 : index
    %c0_22 = arith.constant 0 : index
    %35 = vector.load %arg5[%c640, %c0_22] : memref<896x128xbf16, #tpu.memory_space<vmem>>, vector<128x128xbf16>
    %cst_23 = arith.constant dense<0.000000e+00> : vector<8x128xf32>
    %36 = tpu.matmul %34, %35, %cst_23 {dimension_numbers = #tpu.dot_dimension_numbers<[1], [0], [0], [1], [0, 0, 1, 1], [], []>} : vector<8x128xbf16>, vector<128x128xbf16>, vector<8x128xf32> -> vector<8x128xf32>
    %37 = arith.addf %33, %36 : vector<8x128xf32>
    %38 = arith.truncf %30 : vector<8x128xf32> to vector<8x128xbf16>
    %c768 = arith.constant 768 : index
    %c0_24 = arith.constant 0 : index
    %39 = vector.load %arg5[%c768, %c0_24] : memref<896x128xbf16, #tpu.memory_space<vmem>>, vector<128x128xbf16>
    %cst_25 = arith.constant dense<0.000000e+00> : vector<8x128xf32>
    %40 = tpu.matmul %38, %39, %cst_25 {dimension_numbers = #tpu.dot_dimension_numbers<[1], [0], [0], [1], [0, 0, 1, 1], [], []>} : vector<8x128xbf16>, vector<128x128xbf16>, vector<8x128xf32> -> vector<8x128xf32>
    %41 = arith.addf %37, %40 : vector<8x128xf32>
    %42 = vector.broadcast %13 : vector<1x128xf32> to vector<8x128xf32>
    %43 = arith.addf %41, %42 : vector<8x128xf32>
    %cst_26 = arith.constant 0.000000e+00 : f32
    %44 = vector.broadcast %cst_26 : f32 to vector<8x128xf32>
    %45 = arith.maximumf %43, %44 : vector<8x128xf32>
    %46 = arith.truncf %45 : vector<8x128xf32> to vector<8x128xbf16>
    %c0_27 = arith.constant 0 : index
    %c0_28 = arith.constant 0 : index
    %47 = vector.load %arg6[%c0_27, %c0_28] : memref<128x128xbf16, #tpu.memory_space<vmem>>, vector<128x128xbf16>
    %cst_29 = arith.constant dense<0.000000e+00> : vector<8x128xf32>
    %48 = tpu.matmul %46, %47, %cst_29 {dimension_numbers = #tpu.dot_dimension_numbers<[1], [0], [0], [1], [0, 0, 1, 1], [], []>} : vector<8x128xbf16>, vector<128x128xbf16>, vector<8x128xf32> -> vector<8x128xf32>
    %49 = vector.broadcast %14 : vector<1x128xf32> to vector<8x128xf32>
    %50 = arith.addf %48, %49 : vector<8x128xf32>
    %cst_30 = arith.constant dense<0xFF800000> : vector<8xf32>
    %51 = vector.multi_reduction <maximumf>, %50, %cst_30 [1] : vector<8x128xf32> to vector<8xf32>
    %52 = vector.shape_cast %51 : vector<8xf32> to vector<8x1xf32>
    %53 = vector.broadcast %52 : vector<8x1xf32> to vector<8x128xf32>
    %54 = arith.subf %50, %53 : vector<8x128xf32>
    %55 = math.exp %54 : vector<8x128xf32>
    %cst_31 = arith.constant dense<0.000000e+00> : vector<8xf32>
    %56 = vector.multi_reduction <add>, %55, %cst_31 [1] : vector<8x128xf32> to vector<8xf32>
    %57 = vector.shape_cast %56 : vector<8xf32> to vector<8x1xf32>
    %58 = vector.broadcast %57 : vector<8x1xf32> to vector<8x128xf32>
    %59 = arith.divf %55, %58 : vector<8x128xf32>
    %c0_32 = arith.constant 0 : index
    %c0_33 = arith.constant 0 : index
    %60 = vector.load %arg8[%c0_32, %c0_33] : memref<8x128xf32, #tpu.memory_space<vmem>>, vector<8x128xf32>
    tpu.vector_store %arg8[%c0_32, %c0_33], %59 {strides = array<i32>} : memref<8x128xf32, #tpu.memory_space<vmem>>, vector<8x128xf32>,
    return
  }
  func.func @transform_0(%arg0: i32) -> (i32, i32) {
    %c0_i32 = arith.constant 0 : i32
    %c0_i32_0 = arith.constant 0 : i32
    return %arg0, %c0_i32 : i32, i32
  }
  func.func @transform_1(%arg0: i32) -> (i32, i32) {
    %c0_i32 = arith.constant 0 : i32
    %c0_i32_0 = arith.constant 0 : i32
    return %arg0, %c0_i32 : i32, i32
  }
  func.func @transform_2(%arg0: i32) -> (i32, i32) {
    %c0_i32 = arith.constant 0 : i32
    %c0_i32_0 = arith.constant 0 : i32
    %c0_i32_1 = arith.constant 0 : i32
    return %c0_i32, %c0_i32_0 : i32, i32
  }
  func.func @transform_3(%arg0: i32) -> (i32, i32) {
    %c0_i32 = arith.constant 0 : i32
    %c0_i32_0 = arith.constant 0 : i32
    %c0_i32_1 = arith.constant 0 : i32
    return %c0_i32, %c0_i32_0 : i32, i32
  }
  func.func @transform_4(%arg0: i32) -> (i32, i32) {
    %c0_i32 = arith.constant 0 : i32
    %c0_i32_0 = arith.constant 0 : i32
    %c0_i32_1 = arith.constant 0 : i32
    return %c0_i32, %c0_i32_0 : i32, i32
  }
  func.func @transform_5(%arg0: i32) -> (i32, i32) {
    %c0_i32 = arith.constant 0 : i32
    %c0_i32_0 = arith.constant 0 : i32
    %c0_i32_1 = arith.constant 0 : i32
    return %c0_i32, %c0_i32_0 : i32, i32
  }
  func.func @transform_6(%arg0: i32) -> (i32, i32) {
    %c0_i32 = arith.constant 0 : i32
    %c0_i32_0 = arith.constant 0 : i32
    %c0_i32_1 = arith.constant 0 : i32
    return %c0_i32, %c0_i32_0 : i32, i32
  }
  func.func @transform_7(%arg0: i32) -> (i32, i32) {
    %c0_i32 = arith.constant 0 : i32
    %c0_i32_0 = arith.constant 0 : i32
    return %arg0, %c0_i32 : i32, i32
  }
}

</mosaic_0001>

<bundles_post_ra>
// kernel: place_critic_forward.1
= control target key start
LH: loop header
LB: loop body
LE: loop exit
PB: predicated region body
PF: predicated region fallthrough
CT: control target
= control target key end

     0   :  { %12 = vsyncpa [#allocation3], 0  ;;  %s1359_s0 = inlined_call_operand.vmem [shape: f32[8,8], index: 0, kind: input, shape index: {}]   ;;  %s1360_s1 = inlined_call_operand.vmem [shape: f32[8,2], index: 1, kind: input, shape index: {}]   ;;  %s1361_s2 = inlined_call_operand.vmem [shape: bf16[8,640], index: 2, kind: input, shape index: {}]   ;;  %s1362_s3 = inlined_call_operand.vmem [shape: f32[1,640], index: 3, kind: input, shape index: {}]   ;;  %s1363_s4 = inlined_call_operand.hbm [shape: bf16[896,128], index: 4, kind: input, shape index: {}]   ;;  %s1364_s5 = inlined_call_operand.hbm [shape: bf16[128,128], index: 5, kind: input, shape index: {}]   ;;  %s1365_s6 = inlined_call_operand.vmem [shape: f32[8,128], index: 6, kind: input, shape index: {}]   ;;  %s1366_s7 = inlined_call_operand.vmem [shape: f32[8,128], index: 7, kind: output, shape index: {}]  }
   0x1   :  { %s26_s26 = sshll.u32 %s1363_s4, 4  ;;  %s27_s26 = int_to_ptr.hbm [resolvable:$true] %s26_s26 }
   0x2   :  { %13 = vsyncpa [#allocation5], 0  ;;  %s1258_s27 = smov [#allocation2]   ;;  %s39_s8 = sshll.u32 %s1364_s5, 4  ;;  %s40_s8 = int_to_ptr.hbm [resolvable:$true] %s39_s8 }
   0x3   :  { %s28_s28 = sshll.u32 %s1258_s27, 4  ;;  %s1259_s9 = smov 64   ;;  %s29_s28 = int_to_ptr.vmem [resolvable:$true] %s28_s28 }
   0x4   :  { %s1260_s10 = smov 4   ;;  %s1261_s11 = smov [#allocation4]  }
   0x5   :  { %34 = dma.hbm_to_vmem [thread:$0]  %s27_s26, 7168, %s29_s28, [#allocation3], %s1259_s9, %s1259_s9, %s1260_s10  }
   0x6   :  { %s41_s12 = sshll.u32 %s1261_s11, 4  ;;  %s42_s12 = int_to_ptr.vmem [resolvable:$true] %s41_s12 }
   0x7   :  { %47 = dma.hbm_to_vmem [thread:$0]  %s40_s8, 1024, %s42_s12, [#allocation5], %s1259_s9, %s1259_s9, %s1260_s10  }
   0x8   :  { %1254 = dma.done.wait [#allocation3], 7168  }
   0x9   :  { %1255 = vsyncadd [#allocation3], 4294960128 }
   0xa   :  { %1256 = dma.done.wait [#allocation5], 1024  }
   0xb   :  { %1257 = vsyncadd [#allocation5], 4294966272  ;;  %v1262_v0 = vmov 0   ;;  %v61_v1 = vld [vmem:[%s1361_s2] sm:$0xff]  ;;  %v63_v2 = vld [vmem:[%s1361_s2 + $0x10] sm:$0xf] }
   0xc   :  { %1194 = vset.pattern.permute.xlu0 %v1262_v0  ;;  %v79_v3 = vunpack.c.l.b16 %v61_v1  ;;  %v80_v4 = vunpack.c.h.b16 %v61_v1  ;;  %v83_v5 = vunpack.c.l.b16 %v63_v2  ;;  %v62_v6 = vld [vmem:[%s1361_s2 + $0x8] sm:$0xff]  ;;  %v185_v7 = vld [vmem:[%s1360_s1] sm:$0xff]  ;;  %vm93_vm0 = vcmask 1043456   ;;  %v1171_v16 = vld [vmem:[#allocation2 + $0x178] sm:$0xff] }
   0xd   :  { %v59_v8 = vld [vmem:[%s1359_s0] sm:$0xff]  ;;  %v81_v9 = vunpack.c.l.b16 %v62_v6  ;;  %v82_v10 = vunpack.c.h.b16 %v62_v6  ;;  %188 = vperm.xlu0 %1194, %v185_v7   ;;  %vm89_vm1 = vcmask 64512   ;;  %v1170_v23 = vld [vmem:[#allocation2 + $0x170] sm:$0xff]  ;;  %v1131_v24 = vld [vmem:[#allocation2 + $0x38] sm:$0xff]  ;;  %v1263_v27 = vmov 1  }
   0xe   :  { %v84_v11 = vpack.c.b16 %v79_v3, %v79_v3  ;;  %v85_v12 = vpack.c.b16 %v80_v4, %v80_v4  ;;  %v88_v13 = vpack.c.b16 %v83_v5, %v83_v5  ;;  %v60_v19 = vpack.c.bf16 %v59_v8, %v59_v8  ;;  %v1139_v25 = vld [vmem:[#allocation2 + $0x78] sm:$0xff]  ;;  %v1169_v28 = vld [vmem:[#allocation2 + $0x168] sm:$0xff]  ;;  %v1130_v29 = vld [vmem:[#allocation2 + $0x30] sm:$0xff] }
   0xf   :  { %v86_v14 = vpack.c.b16 %v81_v9, %v81_v9  ;;  %v87_v15 = vpack.c.b16 %v82_v10, %v82_v10  ;;  %v1147_v26 = vld [vmem:[#allocation2 + $0xb8] sm:$0xff]  ;;  %v1138_v30 = vld [vmem:[#allocation2 + $0x70] sm:$0xff]  ;;  %v1168_v32 = vld [vmem:[#allocation2 + $0x160] sm:$0xff] }
  0x10   :  { %v95_v17 = vsel %vm93_vm0, %v84_v11, 0  ;;  %v98_v18 = vsel %vm93_vm0, %v85_v12, 0  ;;  %v107_v20 = vsel %vm93_vm0, %v88_v13, 0  ;;  %v1146_v31 = vld [vmem:[#allocation2 + $0xb0] sm:$0xff]  ;;  %v1129_v33 = vld [vmem:[#allocation2 + $0x28] sm:$0xff]  ;;  %v1167_v35 = vld [vmem:[#allocation2 + $0x158] sm:$0xff] }
  0x11   :  { %116 = vmatpush.bf16.msra.mxu0 %v95_v17  ;;  %129 = vmatpush.bf16.msra.mxu1 %v98_v18  ;;  %v101_v21 = vsel %vm93_vm0, %v86_v14, 0  ;;  %v104_v22 = vsel %vm93_vm0, %v87_v15, 0  ;;  %v1137_v34 = vld [vmem:[#allocation2 + $0x68] sm:$0xff]  ;;  %v1128_v36 = vld [vmem:[#allocation2 + $0x20] sm:$0xff]  ;;  %v1166_v38 = vld [vmem:[#allocation2 + $0x150] sm:$0xff] }
  0x12   :  { %142 = vmatpush.bf16.msra.mxu2 %v101_v21  ;;  %155 = vmatpush.bf16.msra.mxu3 %v104_v22  ;;  %v1136_v37 = vld [vmem:[#allocation2 + $0x60] sm:$0xff]  ;;  %v1127_v39 = vld [vmem:[#allocation2 + $0x18] sm:$0xff]  ;;  %v1165_v41 = vld [vmem:[#allocation2 + $0x148] sm:$0xff] }
  0x13   :  { %v1135_v40 = vld [vmem:[#allocation2 + $0x58] sm:$0xff]  ;;  %v1126_v42 = vld [vmem:[#allocation2 + $0x10] sm:$0xff]  ;;  %v1164_v44 = vld [vmem:[#allocation2 + $0x140] sm:$0xff] }
  0x14   :  { %863 = vmatmul.msk.bf16.vlgmr.msra.gmra.mxu0 %vm89_vm1, %v60_v19  ;;  %864 = vmatmul.msk.bf16.vlgmr.msra.gmra.mxu1 %vm89_vm1, %v60_v19  ;;  %v1134_v43 = vld [vmem:[#allocation2 + $0x50] sm:$0xff]  ;;  %v1125_v45 = vld [vmem:[#allocation2 + $0x8] sm:$0xff]  ;;  %v1155_v47 = vld [vmem:[#allocation2 + $0xf8] sm:$0xff] }
  0x15   :  { %168 = vmatpush.bf16.msrb.mxu0 %v107_v20  ;;  %355 = vmatpush.bf16.msrb.mxu1 %v1171_v16  ;;  %v1133_v46 = vld [vmem:[#allocation2 + $0x48] sm:$0xff]  ;;  %v1124_v48 = vld [vmem:[#allocation2] sm:$0xff]  ;;  %v1154_v50 = vld [vmem:[#allocation2 + $0xf0] sm:$0xff] }
  0x16   :  { %865 = vmatmul.msk.bf16.vlgmr.msra.gmra.mxu2 %vm89_vm1, %v60_v19  ;;  %1195 = vset.pattern.permute.xlu0 %v1263_v27  ;;  %v1132_v49 = vld [vmem:[#allocation2 + $0x40] sm:$0xff]  ;;  %v1163_v51 = vld [vmem:[#allocation2 + $0x138] sm:$0xff]  ;;  %v1145_v53 = vld [vmem:[#allocation2 + $0xa8] sm:$0xff] }
  0x17   :  { %866 = vmatmul.msk.bf16.vlgmr.msra.gmra.mxu3 %vm89_vm1, %v60_v19  ;;  %197 = vperm.xlu0 %1195, %v185_v7   ;;  %v1179_v52 = vld [vmem:[#allocation2 + $0x1b8] sm:$0xff]  ;;  %v1153_v54 = vld [vmem:[#allocation2 + $0xe8] sm:$0xff]  ;;  %v1162_v55 = vld [vmem:[#allocation2 + $0x130] sm:$0xff] }
  0x18   :  { %608 = vmatpush.bf16.msrb.mxu2 %v1131_v24  ;;  %621 = vmatpush.bf16.msrb.mxu3 %v1139_v25  ;;  %v1178_v56 = vld [vmem:[#allocation2 + $0x1b0] sm:$0xff]  ;;  %v1144_v57 = vld [vmem:[#allocation2 + $0xa0] sm:$0xff]  ;;  %v1161_v59 = vld [vmem:[#allocation2 + $0x128] sm:$0xff] }
  0x19   :  { %356 = vmatpush.bf16.msrb.mxu1 %v1170_v23  ;;  %634 = vmatpush.bf16.msra.mxu0 %v1147_v26  ;;  %v1152_v58 = vld [vmem:[#allocation2 + $0xe0] sm:$0xff]  ;;  %v1177_v60 = vld [vmem:[#allocation2 + $0x1a8] sm:$0xff]  ;;  %v1143_v61 = vld [vmem:[#allocation2 + $0x98] sm:$0xff] }
  0x1a   :  { %v1151_v62 = vld [vmem:[#allocation2 + $0xd8] sm:$0xff]  ;;  %v1160_v63 = vld [vmem:[#allocation2 + $0x120] sm:$0xff]  ;;  %v1142_v1 = vld [vmem:[#allocation2 + $0x90] sm:$0xff] }
  0x1b   :  { %v1176_v0 = vld [vmem:[#allocation2 + $0x1a0] sm:$0xff]  ;;  %v1150_v2 = vld [vmem:[#allocation2 + $0xd0] sm:$0xff]  ;;  %v1159_v3 = vld [vmem:[#allocation2 + $0x118] sm:$0xff] }
  0x1c   :  { %609 = vmatpush.bf16.msrb.mxu2 %v1130_v29  ;;  %622 = vmatpush.bf16.msrb.mxu3 %v1138_v30  ;;  %v1175_v4 = vld [vmem:[#allocation2 + $0x198] sm:$0xff]  ;;  %v1141_v5 = vld [vmem:[#allocation2 + $0x88] sm:$0xff]  ;;  %v1158_v7 = vld [vmem:[#allocation2 + $0x110] sm:$0xff] }
  0x1d   :  { %357 = vmatpush.bf16.msrb.mxu1 %v1169_v28  ;;  %635 = vmatpush.bf16.msra.mxu0 %v1146_v31  ;;  %v1149_v6 = vld [vmem:[#allocation2 + $0xc8] sm:$0xff]  ;;  %v1174_v8 = vld [vmem:[#allocation2 + $0x190] sm:$0xff]  ;;  %v1196_v9 = vld [vmem:[%s1365_s6] ss:$0 sm:$0xff] }
  0x1e   :  { %v1140_v10 = vld [vmem:[#allocation2 + $0x80] sm:$0xff]  ;;  %v1157_v14 = vld [vmem:[#allocation2 + $0x108] sm:$0xff] }
  0x1f   :  { %v1197_v11 = vld [vmem:[%s1365_s6 + $0x1] ss:$0 sm:$0xff]  ;;  %v1173_v16 = vld [vmem:[#allocation2 + $0x188] sm:$0xff]  ;;  %v1198_v31 = vld [vmem:[%s1365_s6 + $0x2] ss:$0 sm:$0xff] }
  0x20   :  { %610 = vmatpush.bf16.msrb.mxu2 %v1129_v33  ;;  %623 = vmatpush.bf16.msrb.mxu3 %v1137_v34  ;;  %v1148_v13 = vld [vmem:[#allocation2 + $0xc0] sm:$0xff] }
  0x21   :  { %358 = vmatpush.bf16.msrb.mxu1 %v1168_v32  ;;  %636 = vmatpush.bf16.msra.mxu0 %v1145_v53  ;;  %v1156_v18 = vld [vmem:[#allocation2 + $0x100] sm:$0xff] }
  0x22   :  { %v64_v22 = vld [vmem:[%s1362_s3] sm:$0x1f] }
  0x23   :  { %v66_v23 = vperm.slane %v64_v22, 0  ;;  %v67_v24 = vperm.slane %v64_v22, 1  ;;  %v68_v32 = vperm.slane %v64_v22, 2 }
  0x24   :  { %611 = vmatpush.bf16.msrb.mxu2 %v1128_v36  ;;  %867 = vmatmul.msk.bf16.vlgmr.msrb.gmra.mxu0 %vm89_vm1, %v60_v19  ;;  %v1172_v19 = vld [vmem:[#allocation2 + $0x180] sm:$0xff]  ;;  %v69_v36 = vperm.slane %v64_v22, 3 }
  0x25   :  { %359 = vmatpush.bf16.msrb.mxu1 %v1167_v35  ;;  %624 = vmatpush.bf16.msrb.mxu3 %v1136_v37 }
  0x26   :  { %637 = vmatpush.bf16.msra.mxu0 %v1144_v57 }
  0x28   :  { %612 = vmatpush.bf16.msrb.mxu2 %v1127_v39  ;;  %v1199_v39 = vld [vmem:[%s1365_s6 + $0x3] ss:$0 sm:$0xff] }
  0x29   :  { %360 = vmatpush.bf16.msrb.mxu1 %v1166_v38  ;;  %625 = vmatpush.bf16.msrb.mxu3 %v1135_v40 }
  0x2a   :  { %638 = vmatpush.bf16.msra.mxu0 %v1143_v61  ;;  %v1186_v61 = vld [vmem:[#allocation4 + $0x30] sm:$0xff] }
  0x2c   :  { %613 = vmatpush.bf16.msrb.mxu2 %v1126_v42 }
  0x2d   :  { %361 = vmatpush.bf16.msrb.mxu1 %v1165_v41  ;;  %626 = vmatpush.bf16.msrb.mxu3 %v1134_v43 }
  0x2e   :  { %639 = vmatpush.bf16.msra.mxu0 %v1142_v1 }
  0x30   :  { %614 = vmatpush.bf16.msrb.mxu2 %v1125_v45 }
  0x31   :  { %362 = vmatpush.bf16.msrb.mxu1 %v1164_v44  ;;  %627 = vmatpush.bf16.msrb.mxu3 %v1133_v46 }
  0x32   :  { %640 = vmatpush.bf16.msra.mxu0 %v1141_v5  ;;  %v1180_v5 = vld [vmem:[#allocation4] sm:$0xff] }
  0x34   :  { %615 = vmatpush.bf16.msrb.mxu2 %v1124_v48 }
  0x35   :  { %647 = vmatpush.bf16.msra.mxu1 %v1155_v47  ;;  %628 = vmatpush.bf16.msrb.mxu3 %v1132_v49  ;;  %v70_v49 = vperm.slane %v64_v22, 4 }
  0x36   :  { %641 = vmatpush.bf16.msra.mxu0 %v1140_v10 }
  0x38   :  { %660 = vmatpush.bf16.msra.mxu2 %v1163_v51 }
  0x39   :  { %648 = vmatpush.bf16.msra.mxu1 %v1154_v50  ;;  %738 = vmatpush.bf16.msra.mxu3 %v1179_v52 }
  0x3c   :  { %661 = vmatpush.bf16.msra.mxu2 %v1162_v55 }
  0x3d   :  { %649 = vmatpush.bf16.msra.mxu1 %v1153_v54  ;;  %739 = vmatpush.bf16.msra.mxu3 %v1178_v56 }
  0x40   :  { %662 = vmatpush.bf16.msra.mxu2 %v1161_v59 }
  0x41   :  { %650 = vmatpush.bf16.msra.mxu1 %v1152_v58  ;;  %740 = vmatpush.bf16.msra.mxu3 %v1177_v60  ;;  %v1187_v60 = vld [vmem:[#allocation4 + $0x38] sm:$0xff] }
  0x42   :  { %821 = vmatpush.bf16.msrb.mxu0 %v1187_v60 }
  0x44   :  { %663 = vmatpush.bf16.msra.mxu2 %v1160_v63  ;;  %v1184_v63 = vld [vmem:[#allocation4 + $0x20] sm:$0xff] }
  0x45   :  { %651 = vmatpush.bf16.msra.mxu1 %v1151_v62  ;;  %741 = vmatpush.bf16.msra.mxu3 %v1176_v0  ;;  %v1185_v62 = vld [vmem:[#allocation4 + $0x28] sm:$0xff]  ;;  %v1183_v0 = vld [vmem:[#allocation4 + $0x18] sm:$0xff] }
  0x46   :  { %822 = vmatpush.bf16.msrb.mxu0 %v1186_v61 }
  0x48   :  { %664 = vmatpush.bf16.msra.mxu2 %v1159_v3 }
  0x49   :  { %652 = vmatpush.bf16.msra.mxu1 %v1150_v2  ;;  %742 = vmatpush.bf16.msra.mxu3 %v1175_v4  ;;  %v1182_v2 = vld [vmem:[#allocation4 + $0x10] sm:$0xff]  ;;  %v1181_v4 = vld [vmem:[#allocation4 + $0x8] sm:$0xff] }
  0x4a   :  { %823 = vmatpush.bf16.msrb.mxu0 %v1185_v62 }
  0x4c   :  { %665 = vmatpush.bf16.msra.mxu2 %v1158_v7 }
  0x4d   :  { %653 = vmatpush.bf16.msra.mxu1 %v1149_v6  ;;  %743 = vmatpush.bf16.msra.mxu3 %v1174_v8 }
  0x4e   :  { %824 = vmatpush.bf16.msrb.mxu0 %v1184_v63 }
  0x50   :  { %666 = vmatpush.bf16.msra.mxu2 %v1157_v14 }
  0x51   :  { %654 = vmatpush.bf16.msra.mxu1 %v1148_v13  ;;  %744 = vmatpush.bf16.msra.mxu3 %v1173_v16 }
  0x52   :  { %825 = vmatpush.bf16.msrb.mxu0 %v1183_v0 }
  0x54   :  { %667 = vmatpush.bf16.msra.mxu2 %v1156_v18 }
  0x55   :  { %745 = vmatpush.bf16.msra.mxu3 %v1172_v19 }
  0x56   :  { %826 = vmatpush.bf16.msrb.mxu0 %v1182_v2 }
  0x5a   :  { %827 = vmatpush.bf16.msrb.mxu0 %v1181_v4 }
  0x5e   :  { %828 = vmatpush.bf16.msrb.mxu0 %v1180_v5 }
  0x7f   :  { %v189_v12 = vpop.permute.xlu0 %188 }
  0x80   :  { %v192_v15 = vmul.f32 %v1196_v9, %v189_v12 }
  0x82   :  { %v194_v17 = vadd.f32 %v1197_v11, %v192_v15 }
  0x84   :  { %v195_v20 = vmax.f32 %v194_v17, 0.0 }
  0x86   :  { %v290_v21 = vpack.c.bf16 %v195_v20, %v195_v20 }
  0x88   :  { %363 = vmatmul.bf16.vlgmr.msrb.gmra.mxu1 %v290_v21  ;;  %v1200_v21 = vld [vmem:[%s1365_s6 + $0x4] ss:$0 sm:$0xff] }
  0x89   :  { %v198_v33 = vpop.permute.xlu0 %197 }
  0x8a   :  { %v201_v38 = vmul.f32 %v1198_v31, %v198_v33 }
  0x8c   :  { %v203_v46 = vadd.f32 %v1199_v39, %v201_v38 }
  0x8e   :  { %v204_v51 = vmax.f32 %v203_v46, 0.0 }
  0x90   :  { %v673_v56 = vpack.c.bf16 %v204_v51, %v204_v51 }
  0x91   :  { %v118_v25 = vpop.f32.mrf.mxu0  ;;  %v131_v26 = vpop.f32.mrf.mxu1 }
  0x92   :  { %v119_v27 = vadd.f32 %v118_v25, %v66_v23  ;;  %v132_v28 = vadd.f32 %v131_v26, %v67_v24 }
  0x94   :  { %v174_v29 = vmax.f32 %v119_v27, 0.0  ;;  %v175_v30 = vmax.f32 %v132_v28, 0.0  ;;  %v1201_v28 = vld [vmem:[%s1365_s6 + $0x5] ss:$0 sm:$0xff] }
  0x96   :  { %v205_v34 = vpack.c.bf16 %v174_v29, %v174_v29  ;;  %v206_v35 = vpack.c.bf16 %v175_v30, %v175_v30 }
  0x98   :  { %616 = vmatmul.bf16.vlgmr.msrb.gmra.mxu2 %v205_v34  ;;  %629 = vmatmul.bf16.vlgmr.msrb.gmra.mxu3 %v206_v35 }
  0x99   :  { %v144_v37 = vpop.f32.mrf.mxu2  ;;  %v120_v40 = vpop.f32.mrf.mxu0 }
  0x9a   :  { %v133_v41 = vpop.f32.mrf.mxu1  ;;  %v145_v42 = vadd.f32 %v144_v37, %v68_v32  ;;  %v157_v43 = vpop.f32.mrf.mxu3 }
  0x9b   :  { %v158_v45 = vadd.f32 %v157_v43, %v69_v36 }
  0x9c   :  { %v176_v44 = vmax.f32 %v145_v42, 0.0 }
  0x9d   :  { %v177_v48 = vmax.f32 %v158_v45, 0.0 }
  0x9e   :  { %v207_v47 = vpack.c.bf16 %v176_v44, %v176_v44 }
  0x9f   :  { %v208_v50 = vpack.c.bf16 %v177_v48, %v177_v48 }
  0xa0   :  { %642 = vmatmul.bf16.vlgmr.msra.gmra.mxu0 %v207_v47 }
  0xa1   :  { %v146_v52 = vpop.f32.mrf.mxu2  ;;  %v170_v53 = vpop.f32.mrf.mxu0  ;;  %655 = vmatmul.bf16.vlgmr.msra.gmra.mxu1 %v208_v50 }
  0xa2   :  { %v171_v54 = vadd.f32 %v170_v53, %v70_v49  ;;  %v159_v55 = vpop.f32.mrf.mxu3 }
  0xa4   :  { %v178_v57 = vmax.f32 %v171_v54, 0.0 }
  0xa6   :  { %v209_v58 = vpack.c.bf16 %v178_v57, %v178_v57 }
  0xa8   :  { %668 = vmatmul.bf16.vlgmr.msra.gmra.mxu2 %v209_v58  ;;  %746 = vmatmul.bf16.vlgmr.msra.gmra.mxu3 %v673_v56 }
  0xa9   :  { %v172_v59 = vpop.f32.mrf.mxu0 }
 0x105   :  { %v364_v1 = vpop.f32.mrf.mxu1 }
 0x10d   :  { %v366_v3 = vpop.f32.mrf.mxu1 }
 0x11b   :  { %v617_v6 = vpop.f32.mrf.mxu2  ;;  %v630_v7 = vpop.f32.mrf.mxu3 }
 0x11c   :  { %v618_v9 = vadd.f32 %v617_v6, %v364_v1 }
 0x11d   :  { %v643_v8 = vpop.f32.mrf.mxu0 }
 0x11e   :  { %v656_v10 = vpop.f32.mrf.mxu1  ;;  %v631_v11 = vadd.f32 %v630_v7, %v618_v9 }
 0x120   :  { %v644_v15 = vadd.f32 %v643_v8, %v631_v11 }
 0x122   :  { %v657_v17 = vadd.f32 %v656_v10, %v644_v15 }
 0x123   :  { %v619_v12 = vpop.f32.mrf.mxu2  ;;  %v632_v13 = vpop.f32.mrf.mxu3 }
 0x125   :  { %v645_v14 = vpop.f32.mrf.mxu0 }
 0x126   :  { %v658_v16 = vpop.f32.mrf.mxu1 }
 0x12b   :  { %v669_v18 = vpop.f32.mrf.mxu2  ;;  %v747_v19 = vpop.f32.mrf.mxu3 }
 0x12c   :  { %v670_v20 = vadd.f32 %v669_v18, %v657_v17 }
 0x12e   :  { %v751_v22 = vadd.f32 %v747_v19, %v670_v20 }
 0x130   :  { %v753_v23 = vadd.f32 %v1200_v21, %v751_v22 }
 0x132   :  { %v754_v24 = vmax.f32 %v753_v23, 0.0 }
 0x133   :  { %v671_v25 = vpop.f32.mrf.mxu2  ;;  %v749_v26 = vpop.f32.mrf.mxu3 }
 0x134   :  { %v755_v27 = vpack.c.bf16 %v754_v24, %v754_v24 }
 0x136   :  { %829 = vmatmul.bf16.vlgmr.msrb.gmra.mxu0 %v755_v27 }
 0x1b3   :  { %v830_v29 = vpop.f32.mrf.mxu0 }
 0x1b4   :  { %v831_v30 = vadd.f32 %v1201_v28, %v830_v29 }
 0x1b6   :  { %834 = vmax.xlane.f32.xlu1 %v831_v30 }
 0x1bb   :  { %v832_v31 = vpop.f32.mrf.mxu0 }
 0x229   :  { %v835_v32 = vpop.xlane.xlu1 %834 }
 0x22a   :  { %v836_v33 = vsub.f32 %v831_v30, %v835_v32 }
 0x22c   :  { %v837_v34 = vmul.f32 1.442695, %v836_v33 }
 0x22e   :  { %1202 = vpow2.f32 %v837_v34 }
 0x234   :  { %v1203_v35 = vpop.eup %1202 }
 0x235   :  { %839 = vadd.xlane.f32.xlu1 %v1203_v35 }
 0x2a8   :  { %v840_v36 = vpop.xlane.xlu1 %839 }
 0x2a9   :  { %1204 = vrcp.f32 %v840_v36  ;;  %v852_v40 = vand.u32 2147483648, %v840_v36  ;;  %v850_v42 = vand.u32 2147483647, %v840_v36  ;;  %vm846_vm3 = vweird.f32 %v840_v36 }
 0x2ab   :  { %v853_v44 = vor.u32 1.1754944e-38, %v852_v40  ;;  %vm851_vm5 = vcmp.eq.f32.partialorder %v850_v42, 8.507059e+37 }
 0x2af   :  { %v1205_v37 = vpop.eup %1204 }
 0x2b0   :  { %v842_v38 = vmul.f32 %v1205_v37, %v840_v36  ;;  %vm847_vm2 = vweird.f32 %v1205_v37 }
 0x2b1   :  { %vm848_vm4 = vmor %vm846_vm3, %vm847_vm2 }
 0x2b2   :  { %v843_v39 = vsub.f32 1.0, %v842_v38 }
 0x2b4   :  { %v844_v41 = vmul.f32 %v1205_v37, %v843_v39 }
 0x2b6   :  { %v845_v43 = vadd.f32 %v1205_v37, %v844_v41 }
 0x2b8   :  { %v849_v45 = vsel %vm848_vm4, %v1205_v37, %v845_v43 }
 0x2b9   :  { %v854_v46 = vsel %vm851_vm5, %v853_v44, %v849_v45 }
 0x2ba   :  { %v855_v47 = vmul.f32 %v1203_v35, %v854_v46 }
 0x2bc   :  { %856 = vst [vmem:[%s1366_s7] sm:$0xff] %v855_v47 }
 0x2bd   :  { %861 = vsyncpa [#allocation3], 1 }
 0x2be   :  { %862 = vsyncpa [#allocation5], 1 }

</bundles_post_ra>
